<compile_context>
chip_gen: v5e
topology: v5e:2x2
jax: 0.10.0
libtpu: 0.0.40
codegen_flags: <defaults>
</compile_context>

<pallas_src>
import functools

import jax
import jax.numpy as jnp
from jax import lax
from jax.experimental import pallas as pl
from jax.experimental.pallas import tpu as pltpu


def discriminator_kernel(x_ref, w1_ref, b1_ref, w2_ref, b2_ref, o_ref):
    # Layer 1 on the MXU with f32 accumulation: [tb, D] @ [D, 128] -> [tb, 128].
    h = jnp.dot(x_ref[...], w1_ref[...], preferred_element_type=jnp.float32)
    h = h + b1_ref[...]                       # [1, 128] bias broadcast
    # LeakyReLU(negative_slope=0.1): a single vmax per vreg.
    h = jnp.maximum(h, 0.1 * h)
    # Layer 2 (N = 1) on the MXU with the RHS transposed so the result lands
    # lane-dense: [1, 128] x [tb, 128]^T -> [1, tb].
    logits = lax.dot_general(
        w2_ref[...], h,
        dimension_numbers=(((1,), (1,)), ((), ())),
        preferred_element_type=jnp.float32)
    logits = logits + b2_ref[0, 0]            # scalar bias from SMEM
    # Sigmoid on the lane-dense logits (EUP exp + reciprocal), store f32.
    o_ref[...] = jax.nn.sigmoid(logits).astype(o_ref.dtype)


def _choose_tile(batch, img_dim, tile_b=None):
    """Pick the batch tile: large enough to amortize per-step overhead,
    small enough (~24 MiB for the double-buffered x tiles) to fit VMEM on
    every TPU generation (incl. v7x's 64 MiB)."""
    if tile_b is None:
        budget = 24 * 1024 * 1024             # bytes for 2 x (tb, D) f32 bufs
        tb = budget // (2 * img_dim * 4)
        tb = max(128, min(32768, (tb // 128) * 128))
    else:
        tb = max(128, (int(tile_b) // 128) * 128)
    if batch <= tb:
        return batch, 1                        # single full-extent block
    return tb, pl.cdiv(batch, tb)


@functools.partial(jax.jit, static_argnames=("tile_b",))
def discriminator_forward(x, w1, b1, w2, b2, *, tile_b=None):
    """x: [B, img_dim] (f32) -> [B, 1] sigmoid probabilities (f32)."""
    B, D = x.shape
    H = w1.shape[1]

    tb, n_tiles = _choose_tile(B, D, tile_b)
    b_pad = n_tiles * tb

    b1_r = b1.reshape(1, H).astype(jnp.float32)
    w2_row = w2.reshape(1, H).astype(jnp.float32)   # lane-dense row (== w2^T)
    b2_s = b2.reshape(1, 1).astype(jnp.float32)     # scalar -> SMEM

    out = pl.pallas_call(
        discriminator_kernel,
        out_shape=jax.ShapeDtypeStruct((1, b_pad), jnp.float32),
        grid=(n_tiles,),
        in_specs=[
            pl.BlockSpec((tb, D), lambda i: (i, 0)),             # x: streamed
            pl.BlockSpec((D, H), lambda i: (0, 0)),              # w1: resident
            pl.BlockSpec((1, H), lambda i: (0, 0)),              # b1: resident
            pl.BlockSpec((1, H), lambda i: (0, 0)),              # w2 row
            pl.BlockSpec(memory_space=pltpu.MemorySpace.SMEM),   # b2 scalar
        ],
        out_specs=pl.BlockSpec((1, tb), lambda i: (0, i)),       # lane-dense
        compiler_params=pltpu.CompilerParams(
            dimension_semantics=("parallel",),       # shard batch on v7x 2 TCs
            vmem_limit_bytes=48 * 1024 * 1024,       # safe on v5e/v6e/v7x
        ),
    )(x, w1, b1_r, w2_row, b2_s)

    # Columns past B (trailing partial x tile) are garbage; slice them away.
    return out.reshape(-1)[:B].reshape(B, 1)


def init_params(key, img_dim, hidden=128):
    """Deterministic parameter init (uniform, PyTorch-Linear-style bounds)."""
    k1, k2, k3, k4 = jax.random.split(key, 4)
    bound1 = 1.0 / jnp.sqrt(img_dim)
    bound2 = 1.0 / jnp.sqrt(hidden)
    w1 = jax.random.uniform(k1, (img_dim, hidden), jnp.float32, -bound1, bound1)
    b1 = jax.random.uniform(k2, (hidden,), jnp.float32, -bound1, bound1)
    w2 = jax.random.uniform(k3, (hidden, 1), jnp.float32, -bound2, bound2)
    b2 = jax.random.uniform(k4, (1,), jnp.float32, -bound2, bound2)
    return w1, b1, w2, b2


def _reference(x, w1, b1, w2, b2):
    h = jnp.dot(x, w1, precision=jax.lax.Precision.HIGHEST) + b1.reshape(1, -1)
    h = jnp.where(h > 0, h, 0.1 * h)
    logits = jnp.dot(h, w2, precision=jax.lax.Precision.HIGHEST) + b2.reshape(1, 1)
    return jax.nn.sigmoid(logits)


if __name__ == "__main__":
    key = jax.random.PRNGKey(0)
    k_x1, k_x2, k_p = jax.random.split(key, 3)

    IMG_DIM = 64            # module is parametric in img_dim; hidden=128 fixed
    w1, b1, w2, b2 = init_params(k_p, IMG_DIM)

    # Case 1: small odd batch -> single full-extent block (grid = 1).
    B1 = 20
    x1 = jax.random.normal(k_x1, (B1, IMG_DIM), jnp.float32)
    out1 = discriminator_forward(x1, w1, b1, w2, b2)
    jax.block_until_ready(out1)
    ref1 = _reference(x1, w1, b1, w2, b2)
    assert out1.shape == (B1, 1)
    assert jnp.allclose(out1, ref1, atol=2e-3, rtol=2e-3), \
        float(jnp.max(jnp.abs(out1 - ref1)))

    # Case 2: multi-step grid with a partial trailing tile (B=300, tb=128):
    # exercises weight residency, lane-dense blocked output, and the
    # cdiv-grid garbage-row slicing path.
    B2 = 300
    x2 = jax.random.normal(k_x2, (B2, IMG_DIM), jnp.float32)
    out2 = discriminator_forward(x2, w1, b1, w2, b2, tile_b=128)
    jax.block_until_ready(out2)
    ref2 = _reference(x2, w1, b1, w2, b2)
    assert out2.shape == (B2, 1)
    assert jnp.allclose(out2, ref2, atol=2e-3, rtol=2e-3), \
        float(jnp.max(jnp.abs(out2 - ref2)))

    print("KERNEL_OK")
</pallas_src>

<mosaic_0001>
module attributes {stable_mosaic.version = 11 : i64} {
  func.func @discriminator_kernel(%arg0: i32, %arg1: memref<20x64xf32, #tpu.memory_space<vmem>>, %arg2: memref<64x128xf32, #tpu.memory_space<vmem>>, %arg3: memref<1x128xf32, #tpu.memory_space<vmem>>, %arg4: memref<1x128xf32, #tpu.memory_space<vmem>>, %arg5: memref<1x1xf32, #tpu.memory_space<smem>>, %arg6: memref<1x20xf32, #tpu.memory_space<vmem>>) attributes {dimension_semantics = [#tpu.dimension_semantics<parallel>], iteration_bounds = array<i64: 1>, scalar_prefetch = 0 : i64, scratch_operands = 0 : i64, tpu.core_type = #tpu.core_type<tc>, window_params = [{transform_indices = @transform_0, window_bounds = array<i64: 20, 64>}, {pipeline_mode = #tpu.pipeline_mode<synchronous>, transform_indices = @transform_1, window_bounds = array<i64: 64, 128>}, {pipeline_mode = #tpu.pipeline_mode<synchronous>, transform_indices = @transform_2, window_bounds = array<i64: 1, 128>}, {pipeline_mode = #tpu.pipeline_mode<synchronous>, transform_indices = @transform_3, window_bounds = array<i64: 1, 128>}, {transform_indices = @transform_4, window_bounds = array<i64: 1, 1>}, {transform_indices = @transform_5, window_bounds = array<i64: 1, 20>}]} {
    %c0 = arith.constant 0 : index
    %c0_0 = arith.constant 0 : index
    %0 = vector.load %arg1[%c0, %c0_0] : memref<20x64xf32, #tpu.memory_space<vmem>>, vector<20x64xf32>
    %c0_1 = arith.constant 0 : index
    %c0_2 = arith.constant 0 : index
    %1 = vector.load %arg2[%c0_1, %c0_2] : memref<64x128xf32, #tpu.memory_space<vmem>>, vector<64x128xf32>
    %cst = arith.constant dense<0.000000e+00> : vector<20x128xf32>
    %2 = tpu.matmul %0, %1, %cst {dimension_numbers = #tpu.dot_dimension_numbers<[1], [0], [0], [1], [0, 0, 1, 1], [], []>} : vector<20x64xf32>, vector<64x128xf32>, vector<20x128xf32> -> vector<20x128xf32>
    %c0_3 = arith.constant 0 : index
    %c0_4 = arith.constant 0 : index
    %3 = vector.load %arg3[%c0_3, %c0_4] : memref<1x128xf32, #tpu.memory_space<vmem>>, vector<1x128xf32>
    %4 = vector.broadcast %3 : vector<1x128xf32> to vector<20x128xf32>
    %5 = arith.addf %2, %4 : vector<20x128xf32>
    %cst_5 = arith.constant 1.000000e-01 : f32
    %6 = vector.broadcast %cst_5 : f32 to vector<20x128xf32>
    %7 = arith.mulf %6, %5 : vector<20x128xf32>
    %8 = arith.maximumf %5, %7 : vector<20x128xf32>
    %c0_6 = arith.constant 0 : index
    %c0_7 = arith.constant 0 : index
    %9 = vector.load %arg4[%c0_6, %c0_7] : memref<1x128xf32, #tpu.memory_space<vmem>>, vector<1x128xf32>
    %cst_8 = arith.constant dense<0.000000e+00> : vector<1x20xf32>
    %10 = tpu.matmul %9, %8, %cst_8 {dimension_numbers = #tpu.dot_dimension_numbers<[1], [1], [0], [0], [0, 0, 1, 0], [], []>} : vector<1x128xf32>, vector<20x128xf32>, vector<1x20xf32> -> vector<1x20xf32>
    %c0_9 = arith.constant 0 : index
    %c0_10 = arith.constant 0 : index
    %11 = memref.load %arg5[%c0_9, %c0_10] : memref<1x1xf32, #tpu.memory_space<smem>>
    %12 = vector.broadcast %11 : f32 to vector<1x20xf32>
    %13 = arith.addf %10, %12 : vector<1x20xf32>
    %14 = arith.negf %13 : vector<1x20xf32>
    %15 = math.exp %14 : vector<1x20xf32>
    %cst_11 = arith.constant 1.000000e+00 : f32
    %16 = vector.broadcast %cst_11 : f32 to vector<1x20xf32>
    %17 = arith.addf %16, %15 : vector<1x20xf32>
    %18 = arith.divf %16, %17 : vector<1x20xf32>
    %c0_12 = arith.constant 0 : index
    %c0_13 = arith.constant 0 : index
    %19 = vector.load %arg6[%c0_12, %c0_13] : memref<1x20xf32, #tpu.memory_space<vmem>>, vector<1x20xf32>
    tpu.vector_store %arg6[%c0_12, %c0_13], %18 {strides = array<i32>} : memref<1x20xf32, #tpu.memory_space<vmem>>, vector<1x20xf32>,
    return
  }
  func.func @transform_0(%arg0: i32) -> (i32, i32) {
    %c0_i32 = arith.constant 0 : i32
    %c0_i32_0 = arith.constant 0 : i32
    return %arg0, %c0_i32 : i32, i32
  }
  func.func @transform_1(%arg0: i32) -> (i32, i32) {
    %c0_i32 = arith.constant 0 : i32
    %c0_i32_0 = arith.constant 0 : i32
    %c0_i32_1 = arith.constant 0 : i32
    return %c0_i32, %c0_i32_0 : i32, i32
  }
  func.func @transform_2(%arg0: i32) -> (i32, i32) {
    %c0_i32 = arith.constant 0 : i32
    %c0_i32_0 = arith.constant 0 : i32
    %c0_i32_1 = arith.constant 0 : i32
    return %c0_i32, %c0_i32_0 : i32, i32
  }
  func.func @transform_3(%arg0: i32) -> (i32, i32) {
    %c0_i32 = arith.constant 0 : i32
    %c0_i32_0 = arith.constant 0 : i32
    %c0_i32_1 = arith.constant 0 : i32
    return %c0_i32, %c0_i32_0 : i32, i32
  }
  func.func @transform_4(%arg0: i32) -> (i32, i32) {
    %c0_i32 = arith.constant 0 : i32
    %c0_i32_0 = arith.constant 0 : i32
    %c0_i32_1 = arith.constant 0 : i32
    return %c0_i32, %c0_i32_0 : i32, i32
  }
  func.func @transform_5(%arg0: i32) -> (i32, i32) {
    %c0_i32 = arith.constant 0 : i32
    %c0_i32_0 = arith.constant 0 : i32
    return %c0_i32, %arg0 : i32, i32
  }
}

</mosaic_0001>

<bundles_post_ra>
// kernel: discriminator_forward.1
= control target key start
LH: loop header
LB: loop body
LE: loop exit
PB: predicated region body
PF: predicated region fallthrough
CT: control target
= control target key end

     0   :  { %11 = vsyncpa [#allocation4], 0  ;;  %s334_s0 = inlined_call_operand.hbm [shape: f32[20,64], index: 0, kind: input, shape index: {}]   ;;  %s335_s1 = inlined_call_operand.hbm [shape: f32[64,128], index: 1, kind: input, shape index: {}]   ;;  %s336_s2 = inlined_call_operand.vmem [shape: f32[1,128], index: 2, kind: input, shape index: {}]   ;;  %s337_s3 = inlined_call_operand.vmem [shape: f32[1,128], index: 3, kind: input, shape index: {}]   ;;  %s338_s4 = inlined_call_operand.<no memory space> [shape: f32[1,1], index: 4, kind: input, shape index: {}]   ;;  %s339_s5 = inlined_call_operand.hbm [shape: f32[1,20], index: 5, kind: output, shape index: {}]  }
   0x1   :  { %12 = vsyncpa [#allocation7], 0 }
   0x2   :  { %13 = vsyncpa [#allocation5], 0  ;;  %s18_s20 = sshll.u32 %s334_s0, 4  ;;  %s281_s21 = smov [#allocation3]   ;;  %s19_s20 = int_to_ptr.hbm [resolvable:$true] %s18_s20 }
   0x3   :  { %s20_s22 = sshll.u32 %s281_s21, 4  ;;  %s31_s25 = sshll.u32 %s335_s1, 4  ;;  %s21_s22 = int_to_ptr.vmem [resolvable:$true] %s20_s22  ;;  %s32_s25 = int_to_ptr.hbm [resolvable:$true] %s31_s25 }
   0x4   :  { %s282_s26 = smov 128   ;;  %s283_s27 = smov 8  }
   0x5   :  { %26 = dma.hbm_to_vmem [thread:$0]  %s19_s20, 384, %s21_s22, [#allocation4], %s282_s26, %s282_s26, %s283_s27  }
   0x6   :  { %s284_s28 = smov [#allocation6]  }
   0x7   :  { %s33_s29 = sshll.u32 %s284_s28, 4  ;;  %s34_s29 = int_to_ptr.vmem [resolvable:$true] %s33_s29 }
   0x8   :  { %39 = dma.hbm_to_vmem [thread:$0]  %s32_s25, 1024, %s34_s29, [#allocation7], %s282_s26, %s282_s26, %s283_s27  }
   0x9   :  { %275 = dma.done.wait [#allocation4], 384  }
   0xa   :  { %276 = vsyncadd [#allocation4], 4294966912 }
   0xb   :  { %277 = dma.done.wait [#allocation7], 1024  }
   0xc   :  { %278 = vsyncadd [#allocation7], 4294966272  ;;  %v64_v0 = vld [vmem:[#allocation6 + $0x38] sm:$0xff]  ;;  %v63_v1 = vld [vmem:[#allocation6 + $0x30] sm:$0xff]  ;;  %vm69_vm0 = vcmask 523264   ;;  %v113_v25 = vstv %s338_s4  ;;  %s162_s4 = sshll.u32 %s339_s5, 4  ;;  %s163_s4 = int_to_ptr.hbm [resolvable:$true] %s162_s4 }
   0xd   :  { %178 = vmatpush.msra.mxu3 %v64_v0  ;;  %177 = vmatpush.msra.mxu2 %v64_v0  ;;  %v62_v2 = vld [vmem:[#allocation6 + $0x28] sm:$0xff]  ;;  %v61_v3 = vld [vmem:[#allocation6 + $0x20] sm:$0xff]  ;;  %v60_v4 = vld [vmem:[#allocation6 + $0x18] sm:$0xff]  ;;  %vm153_vm4 = vcmask 155648  }
   0xe   :  { %87 = vmatpush.msra.mxu0 %v64_v0  ;;  %v59_v5 = vld [vmem:[#allocation6 + $0x10] sm:$0xff]  ;;  %v58_v6 = vld [vmem:[#allocation6 + $0x8] sm:$0xff]  ;;  %v57_v7 = vld [vmem:[#allocation6] sm:$0xff] }
   0xf   :  { %180 = vmatpush.msra.mxu3 %v63_v1  ;;  %179 = vmatpush.msra.mxu2 %v63_v1  ;;  %v56_v8 = vld [vmem:[#allocation3 + $0x10] sm:$0xf]  ;;  %v55_v9 = vld [vmem:[#allocation3 + $0x8] sm:$0xff]  ;;  %v54_v10 = vld [vmem:[#allocation3] sm:$0xff] }
  0x10   :  { %88 = vmatpush.msra.mxu0 %v63_v1  ;;  %v198_v11 = vld [vmem:[%s336_s2] ss:$0 sm:$0xff] }
  0x11   :  { %182 = vmatpush.msra.mxu3 %v62_v2  ;;  %181 = vmatpush.msra.mxu2 %v62_v2  ;;  %v111_v24 = vld [vmem:[%s337_s3] sm:$0x1]  ;;  %s285_s3 = smov [#allocation8]  }
  0x12   :  { %89 = vmatpush.msra.mxu0 %v62_v2  ;;  %s160_s8 = sshll.u32 %s285_s3, 4  ;;  %s161_s8 = int_to_ptr.vmem [resolvable:$true] %s160_s8 }
  0x13   :  { %184 = vmatpush.msra.mxu3 %v61_v3  ;;  %183 = vmatpush.msra.mxu2 %v61_v3 }
  0x14   :  { %90 = vmatpush.msra.mxu0 %v61_v3 }
  0x15   :  { %186 = vmatpush.msra.mxu3 %v60_v4  ;;  %185 = vmatpush.msra.mxu2 %v60_v4 }
  0x16   :  { %91 = vmatpush.msra.mxu0 %v60_v4 }
  0x17   :  { %188 = vmatpush.msra.mxu3 %v59_v5  ;;  %187 = vmatpush.msra.mxu2 %v59_v5 }
  0x18   :  { %92 = vmatpush.msra.mxu0 %v59_v5 }
  0x19   :  { %190 = vmatpush.msra.mxu3 %v58_v6  ;;  %189 = vmatpush.msra.mxu2 %v58_v6 }
  0x1a   :  { %93 = vmatpush.msra.mxu0 %v58_v6 }
  0x1b   :  { %192 = vmatpush.msra.mxu3 %v57_v7  ;;  %191 = vmatpush.msra.mxu2 %v57_v7 }
  0x1c   :  { %175 = vmatmul.msk.f32.vlgmr.msra.gmra.mxu3 %vm69_vm0, %v56_v8  ;;  %174 = vmatmul.msk.f32.vlgmr.msra.gmra.mxu2 %vm69_vm0, %v55_v9 }
  0x1d   :  { %94 = vmatpush.msra.mxu0 %v57_v7 }
  0x1e   :  { %173 = vmatmul.msk.f32.vlgmr.msra.gmra.mxu0 %vm69_vm0, %v54_v10 }
  0x9b   :  { %v96_v16 = vpop.f32.mrf.mxu0 }
  0x9c   :  { %v97_v19 = vadd.f32 %v198_v11, %v96_v16 }
  0x9e   :  { %v105_v21 = vmul.f32 0.1, %v97_v19 }
  0x9f   :  { %v102_v12 = vpop.f32.mrf.mxu3  ;;  %v99_v13 = vpop.f32.mrf.mxu2 }
  0xa0   :  { %v103_v14 = vadd.f32 %v198_v11, %v102_v12  ;;  %v100_v15 = vadd.f32 %v198_v11, %v99_v13  ;;  %v108_v23 = vmax.f32 %v97_v19, %v105_v21 }
  0xa2   :  { %v107_v17 = vmul.f32 0.1, %v103_v14  ;;  %v106_v18 = vmul.f32 0.1, %v100_v15 }
  0xa4   :  { %v110_v20 = vmax.f32 %v103_v14, %v107_v17  ;;  %v109_v22 = vmax.f32 %v100_v15, %v106_v18 }
  0xa6   :  { %127 = vmatpush.xpose.msra.mxu1 %v110_v20 }
  0xaa   :  { %128 = vmatpush.xpose.msra.mxu1 %v109_v22 }
  0xae   :  { %129 = vmatpush.xpose.msra.mxu1 %v108_v23 }
  0xb1   :  { %130 = vmatmul.f32.vlgmr.msra.gmra.mxu1 %v111_v24 }
 0x12e   :  { %v131_v26 = vpop.f32.mrf.mxu1 }
 0x12f   :  { %v132_v27 = vadd.f32 %v131_v26, %v113_v25 }
 0x131   :  { %v176_v28 = vmul.f32 -1.442695, %v132_v27 }
 0x133   :  { %199 = vpow2.f32 %v176_v28 }
 0x139   :  { %v200_v29 = vpop.eup %199 }
 0x13a   :  { %v137_v30 = vadd.f32 1.0, %v200_v29 }
 0x13c   :  { %201 = vrcp.f32 %v137_v30  ;;  %v149_v34 = vand.u32 2147483648, %v137_v30  ;;  %v147_v36 = vand.u32 2147483647, %v137_v30  ;;  %vm143_vm2 = vweird.f32 %v137_v30 }
 0x13e   :  { %v150_v38 = vor.u32 1.1754944e-38, %v149_v34  ;;  %vm148_vm5 = vcmp.eq.f32.partialorder %v147_v36, 8.507059e+37 }
 0x142   :  { %v202_v31 = vpop.eup %201 }
 0x143   :  { %v139_v32 = vmul.f32 %v202_v31, %v137_v30  ;;  %vm144_vm1 = vweird.f32 %v202_v31 }
 0x144   :  { %vm145_vm3 = vmor %vm143_vm2, %vm144_vm1 }
 0x145   :  { %v140_v33 = vsub.f32 1.0, %v139_v32 }
 0x147   :  { %v141_v35 = vmul.f32 %v202_v31, %v140_v33 }
 0x149   :  { %v142_v37 = vadd.f32 %v202_v31, %v141_v35 }
 0x14b   :  { %v146_v39 = vsel %vm145_vm3, %v202_v31, %v142_v37 }
 0x14c   :  { %v151_v40 = vsel %vm148_vm5, %v150_v38, %v146_v39 }
 0x14d   :  { %154 = vst.msk [vmem:[#allocation8] sm:$0x1] %vm153_vm4, %v151_v40 }
 0x14e   :  { %165 = dma.vmem_to_hbm [thread:$0]  %s161_s8, 16, %s163_s4, [#allocation5]  }
 0x14f   :  { %279 = dma.done.wait [#allocation5], 16  }
 0x150   :  { %280 = vsyncadd [#allocation5], 4294967280 }
 0x151   :  { %170 = vsyncpa [#allocation4], 1 }
 0x152   :  { %171 = vsyncpa [#allocation7], 1 }
 0x153   :  { %172 = vsyncpa [#allocation5], 1 }

</bundles_post_ra>
